<compile_context>
chip_gen: v7x
topology: tpu7x:2x2x1
jax: 0.10.0
libtpu: 0.0.40
codegen_flags: <defaults>
</compile_context>

<pallas_src>
import functools

import jax
import jax.numpy as jnp
from jax import lax
from jax.experimental import pallas as pl
from jax.experimental.pallas import tpu as pltpu


def _round_up(x, m):
    return (x + m - 1) // m * m


# --------------------------------------------------------------------------
# Kernel A: scores = sigmoid(h @ w + b), tiled over rows (HBM-bound pass).
# --------------------------------------------------------------------------
def _scores_kernel(h_ref, w_ref, b_ref, out_ref):
    # h stays in its native dtype in HBM; cast per-tile on the VPU.
    h = h_ref[...].astype(jnp.float32)                       # (TN, F)
    w = w_ref[...].astype(jnp.float32)                       # (1, F)
    z = jnp.sum(h * w, axis=1, keepdims=True) + b_ref[...]   # lane-reduce -> (TN, 1)
    # sigmoid = 1 / (1 + exp(-z)); reciprocal goes to the (otherwise idle) EUP slot.
    out_ref[...] = pl.reciprocal(1.0 + jnp.exp(-z), approx=False)


def _scores(h, w, b, *, tile_rows=512):
    N, F = h.shape
    TN = min(tile_rows, _round_up(N, 8))
    N_pad = _round_up(N, TN)
    h_pad = h if N_pad == N else jnp.pad(h, ((0, N_pad - N), (0, 0)))
    w_row = w.astype(jnp.float32).reshape(1, F)
    b2 = jnp.asarray(b, jnp.float32).reshape(1, 1)

    out = pl.pallas_call(
        _scores_kernel,
        grid=(N_pad // TN,),
        in_specs=[
            pl.BlockSpec((TN, F), lambda i: (i, 0)),
            pl.BlockSpec((1, F), lambda i: (0, 0)),
            pl.BlockSpec((1, 1), lambda i: (0, 0)),
        ],
        out_specs=pl.BlockSpec((TN, 1), lambda i: (i, 0)),
        out_shape=jax.ShapeDtypeStruct((N_pad, 1), jnp.float32),
        compiler_params=pltpu.CompilerParams(
            dimension_semantics=("parallel",),
            vmem_limit_bytes=32 * 1024 * 1024),
    )(h_pad, w_row, b2)
    return out[:N, 0]


# --------------------------------------------------------------------------
# Kernel B: new_h = h[idx] * values[:, None]  — one-hot selector matmul (MXU).
# --------------------------------------------------------------------------
def _gather_scale_kernel(idx_ref, vals_ref, h_ref, out_ref):
    # idx_ref : (TM, 1) int32    row indices for this output tile
    # vals_ref: (TM, 1) f32      top-k scores for this tile
    # h_ref   : (N, F)           VMEM-resident features (native dtype)
    # out_ref : (TM, F)          disjoint output tile
    n = h_ref.shape[0]
    tm = out_ref.shape[0]
    col_ids = lax.broadcasted_iota(jnp.int32, (tm, n), 1)
    # One-hot selector; sel @ h == h[idx] exactly (0/1 weights, f32 accumulation).
    sel = (col_ids == idx_ref[...]).astype(h_ref.dtype)            # (TM, N)
    gathered = jnp.dot(sel, h_ref[...], preferred_element_type=jnp.float32)
    out_ref[...] = (gathered * vals_ref[...]).astype(out_ref.dtype)


def _gather_scale(h, idx, values, *, tile_rows=256):
    N, F = h.shape
    M = idx.shape[0]
    TM = min(tile_rows, _round_up(M, 8))
    M_pad = _round_up(M, TM)
    # Pad idx with 0 (a valid row) and values with 0; padded rows are sliced off.
    idx_pad = jnp.pad(idx.astype(jnp.int32), (0, M_pad - M)).reshape(M_pad, 1)
    vals_pad = jnp.pad(values.astype(jnp.float32), (0, M_pad - M)).reshape(M_pad, 1)

    out = pl.pallas_call(
        _gather_scale_kernel,
        grid=(M_pad // TM,),
        in_specs=[
            pl.BlockSpec((TM, 1), lambda i: (i, 0)),     # idx tile
            pl.BlockSpec((TM, 1), lambda i: (i, 0)),     # values tile
            pl.BlockSpec((N, F), lambda i: (0, 0)),      # h resident (native dtype)
        ],
        out_specs=pl.BlockSpec((TM, F), lambda i: (i, 0)),
        out_shape=jax.ShapeDtypeStruct((M_pad, F), h.dtype),
        compiler_params=pltpu.CompilerParams(
            dimension_semantics=("parallel",),           # disjoint output tiles
            vmem_limit_bytes=48 * 1024 * 1024),
    )(idx_pad, vals_pad, h)
    return out[:M]


# --------------------------------------------------------------------------
# Kernel C1: row-tiled pooled 2-hop adjacency (0/1) + per-row degree.
# Kernel C2: normalize column j by deg[j] (torch broadcasting of g / g.sum(1)).
# --------------------------------------------------------------------------
def _pool_adj_kernel(g_ref, rowidx_ref, idx_ref, sub_ref, deg_ref, *, num_valid):
    # g_ref     : (N, N)      adjacency, native dtype, binarized in-kernel
    # rowidx_ref: (TM, 1)     idx entries for this row block
    # idx_ref   : (M_pad, 1)  full idx (for the column gather)
    # sub_ref   : (TM, M_pad) 0/1 pooled 2-hop adjacency rows
    # deg_ref   : (TM, 1)     row sums over the M valid columns
    n = g_ref.shape[0]
    m_pad = idx_ref.shape[0]
    tm = sub_ref.shape[0]

    binv = (g_ref[...] != 0).astype(jnp.bfloat16)                      # (N, N) 0/1

    # Row gather: gr = binv[idx_rows, :]  (one-hot selector matmul, exact 0/1).
    col_ids = lax.broadcasted_iota(jnp.int32, (tm, n), 1)
    sel_row = (col_ids == rowidx_ref[...]).astype(jnp.bfloat16)        # (TM, N)
    gr = jnp.dot(sel_row, binv, preferred_element_type=jnp.float32)    # (TM, N) 0/1

    # 2-hop: (binv @ binv)[idx_rows, :] > 0  (bf16 MXU, counts accumulated in f32).
    tmp = jnp.dot(gr.astype(jnp.bfloat16), binv,
                  preferred_element_type=jnp.float32)                  # (TM, N)
    hop2 = (tmp > 0).astype(jnp.bfloat16)                              # (TM, N) 0/1

    # Column gather: sub[r, k] = hop2[r, idx[k]]; padded columns (k >= num_valid) -> 0.
    col_ids_full = lax.broadcasted_iota(jnp.int32, (m_pad, n), 1)
    k_valid = lax.broadcasted_iota(jnp.int32, (m_pad, 1), 0) < num_valid
    sel_col = jnp.logical_and(col_ids_full == idx_ref[...], k_valid
                              ).astype(jnp.bfloat16)                   # (M_pad, N)
    sub = lax.dot_general(hop2, sel_col, (((1,), (1,)), ((), ())),
                          preferred_element_type=jnp.float32)          # (TM, M_pad) 0/1

    sub_ref[...] = sub
    deg_ref[...] = jnp.sum(sub, axis=1, keepdims=True)


def _norm_kernel(sub_ref, deg_row_ref, out_ref):
    # torch broadcasting of `g / g.sum(1)`: entry (i, j) divided by deg[j] (row-sum of row j).
    # Zero-degree nodes give inf, matching the PyTorch reference.
    out_ref[...] = sub_ref[...] * pl.reciprocal(deg_row_ref[...], approx=False)


def _pool_graph(g, idx, *, tile_rows=256):
    N = g.shape[0]
    M = idx.shape[0]
    TM = min(tile_rows, _round_up(M, 8))
    M_pad = _round_up(M, TM)
    idx_pad = jnp.pad(idx.astype(jnp.int32), (0, M_pad - M)).reshape(M_pad, 1)

    sub, deg = pl.pallas_call(
        functools.partial(_pool_adj_kernel, num_valid=M),
        grid=(M_pad // TM,),
        in_specs=[
            pl.BlockSpec((N, N), lambda i: (0, 0)),       # g resident, NATIVE dtype
            pl.BlockSpec((TM, 1), lambda i: (i, 0)),      # idx tile (rows of this block)
            pl.BlockSpec((M_pad, 1), lambda i: (0, 0)),   # full idx (column gather)
        ],
        out_specs=(
            pl.BlockSpec((TM, M_pad), lambda i: (i, 0)),
            pl.BlockSpec((TM, 1), lambda i: (i, 0)),
        ),
        out_shape=(
            jax.ShapeDtypeStruct((M_pad, M_pad), jnp.float32),
            jax.ShapeDtypeStruct((M_pad, 1), jnp.float32),
        ),
        compiler_params=pltpu.CompilerParams(
            dimension_semantics=("parallel",),            # disjoint row blocks
            vmem_limit_bytes=48 * 1024 * 1024),
    )(g, idx_pad, idx_pad)

    deg_row = deg.reshape(1, M_pad)
    new_g = pl.pallas_call(
        _norm_kernel,
        grid=(M_pad // TM,),
        in_specs=[
            pl.BlockSpec((TM, M_pad), lambda i: (i, 0)),
            pl.BlockSpec((1, M_pad), lambda i: (0, 0)),
        ],
        out_specs=pl.BlockSpec((TM, M_pad), lambda i: (i, 0)),
        out_shape=jax.ShapeDtypeStruct((M_pad, M_pad), jnp.float32),
        compiler_params=pltpu.CompilerParams(
            dimension_semantics=("parallel",),
            vmem_limit_bytes=48 * 1024 * 1024),
    )(sub, deg_row)
    return new_g[:M, :M]


# --------------------------------------------------------------------------
# Full forward (Pool.forward) — returns (new_g, new_h, idx) like top_k_graph.
# --------------------------------------------------------------------------
def pool_forward(g, h, proj_w, proj_b, *, k):
    # Dropout == identity (eval mode / p == 0).  TODO(synk): training-mode dropout.
    N, F = h.shape
    scores = _scores(h, proj_w, proj_b)                 # (N,) f32, Pallas kernel A
    M = max(1, int(k * N))
    values, idx = lax.top_k(scores, M)                  # data-dependent selection (host JAX)
    new_h = _gather_scale(h, idx, values)               # (M, F), Pallas kernel B
    new_g = _pool_graph(g, idx)                         # (M, M), Pallas kernels C1/C2
    return new_g, new_h, idx


if __name__ == "__main__":
    key = jax.random.PRNGKey(0)
    k_g, k_h, k_w, k_b = jax.random.split(key, 4)

    N, F = 32, 128          # nodes, feature width (in_dim)
    pool_k = 0.5            # Pool(k=0.5, in_dim=F, p=0.0)

    # Random sparse adjacency with self-loops (keeps degrees > 0, matching typical usage).
    adj = (jax.random.uniform(k_g, (N, N)) < 0.3).astype(jnp.float32)
    g = jnp.clip(adj + jnp.eye(N, dtype=jnp.float32), 0.0, 1.0)
    h = jax.random.normal(k_h, (N, F), dtype=jnp.float32)
    w = jax.random.normal(k_w, (F,), dtype=jnp.float32) * 0.1   # proj.weight (squeezed)
    b = jax.random.normal(k_b, (), dtype=jnp.float32) * 0.1     # proj.bias

    fwd = jax.jit(functools.partial(pool_forward, k=pool_k))
    new_g, new_h, idx = fwd(g, h, w, b)
    jax.block_until_ready((new_g, new_h, idx))

    # ---------------- pure-JAX reference (mirrors the PyTorch code) ----------------
    M = max(1, int(pool_k * N))
    scores_ref = jax.nn.sigmoid(h @ w + b)                       # (N,)
    vals_ref, idx_ref = lax.top_k(scores_ref, M)
    newh_ref = h[idx_ref, :] * vals_ref[:, None]
    ung = (g != 0).astype(jnp.float32)
    ung = ((ung @ ung) != 0).astype(jnp.float32)
    sub = ung[idx_ref, :][:, idx_ref]
    deg = sub.sum(axis=1)
    newg_ref = sub / deg                                         # torch broadcasting semantics

    assert idx.shape == (M,)
    assert new_h.shape == (M, F) and new_h.dtype == h.dtype
    assert new_g.shape == (M, M)
    assert jnp.array_equal(idx, idx_ref)
    assert jnp.allclose(new_h, newh_ref, atol=1e-5, rtol=1e-5)
    assert jnp.allclose(new_g, newg_ref, atol=1e-5, rtol=1e-5)

    print("KERNEL_OK")
</pallas_src>

<mosaic_0001>
module attributes {stable_mosaic.version = 11 : i64} {
  func.func @_pool_adj_kernel(%arg0: i32, %arg1: memref<32x32xf32, #tpu.memory_space<vmem>>, %arg2: memref<16x1xi32, #tpu.memory_space<vmem>>, %arg3: memref<16x1xi32, #tpu.memory_space<vmem>>, %arg4: memref<16x16xf32, #tpu.memory_space<vmem>>, %arg5: memref<16x1xf32, #tpu.memory_space<vmem>>) attributes {dimension_semantics = [#tpu.dimension_semantics<parallel>], iteration_bounds = array<i64: 1>, scalar_prefetch = 0 : i64, scratch_operands = 0 : i64, tpu.core_type = #tpu.core_type<tc>, window_params = [{pipeline_mode = #tpu.pipeline_mode<synchronous>, transform_indices = @transform_0, window_bounds = array<i64: 32, 32>}, {transform_indices = @transform_1, window_bounds = array<i64: 16, 1>}, {pipeline_mode = #tpu.pipeline_mode<synchronous>, transform_indices = @transform_2, window_bounds = array<i64: 16, 1>}, {transform_indices = @transform_3, window_bounds = array<i64: 16, 16>}, {transform_indices = @transform_4, window_bounds = array<i64: 16, 1>}]} {
    %c0 = arith.constant 0 : index
    %c0_0 = arith.constant 0 : index
    %0 = vector.load %arg1[%c0, %c0_0] : memref<32x32xf32, #tpu.memory_space<vmem>>, vector<32x32xf32>
    %cst = arith.constant 0.000000e+00 : f32
    %1 = vector.broadcast %cst : f32 to vector<32x32xf32>
    %2 = arith.cmpf one, %0, %1 : vector<32x32xf32>
    %3 = arith.extui %2 : vector<32x32xi1> to vector<32x32xi32>
    %4 = arith.sitofp %3 : vector<32x32xi32> to vector<32x32xf32>
    %5 = arith.truncf %4 : vector<32x32xf32> to vector<32x32xbf16>
    %6 = tpu.iota {dimensions = array<i32: 1>} : vector<16x32xi32>
    %c0_1 = arith.constant 0 : index
    %c0_2 = arith.constant 0 : index
    %7 = vector.load %arg2[%c0_1, %c0_2] : memref<16x1xi32, #tpu.memory_space<vmem>>, vector<16x1xi32>
    %8 = vector.broadcast %7 : vector<16x1xi32> to vector<16x32xi32>
    %9 = arith.cmpi eq, %6, %8 : vector<16x32xi32>
    %10 = arith.extui %9 : vector<16x32xi1> to vector<16x32xi32>
    %11 = arith.sitofp %10 : vector<16x32xi32> to vector<16x32xf32>
    %12 = arith.truncf %11 : vector<16x32xf32> to vector<16x32xbf16>
    %cst_3 = arith.constant dense<0.000000e+00> : vector<16x32xf32>
    %13 = tpu.matmul %12, %5, %cst_3 {dimension_numbers = #tpu.dot_dimension_numbers<[1], [0], [0], [1], [0, 0, 1, 1], [], []>} : vector<16x32xbf16>, vector<32x32xbf16>, vector<16x32xf32> -> vector<16x32xf32>
    %14 = arith.truncf %13 : vector<16x32xf32> to vector<16x32xbf16>
    %cst_4 = arith.constant dense<0.000000e+00> : vector<16x32xf32>
    %15 = tpu.matmul %14, %5, %cst_4 {dimension_numbers = #tpu.dot_dimension_numbers<[1], [0], [0], [1], [0, 0, 1, 1], [], []>} : vector<16x32xbf16>, vector<32x32xbf16>, vector<16x32xf32> -> vector<16x32xf32>
    %cst_5 = arith.constant 0.000000e+00 : f32
    %16 = vector.broadcast %cst_5 : f32 to vector<16x32xf32>
    %17 = arith.cmpf ogt, %15, %16 : vector<16x32xf32>
    %18 = arith.extui %17 : vector<16x32xi1> to vector<16x32xi32>
    %19 = arith.sitofp %18 : vector<16x32xi32> to vector<16x32xf32>
    %20 = arith.truncf %19 : vector<16x32xf32> to vector<16x32xbf16>
    %21 = tpu.iota {dimensions = array<i32: 1>} : vector<16x32xi32>
    %22 = tpu.iota {dimensions = array<i32: 0>} : vector<16x1xi32>
    %c16_i32 = arith.constant 16 : i32
    %23 = vector.broadcast %c16_i32 : i32 to vector<16x1xi32>
    %24 = arith.cmpi slt, %22, %23 : vector<16x1xi32>
    %c0_6 = arith.constant 0 : index
    %c0_7 = arith.constant 0 : index
    %25 = vector.load %arg3[%c0_6, %c0_7] : memref<16x1xi32, #tpu.memory_space<vmem>>, vector<16x1xi32>
    %26 = vector.broadcast %25 : vector<16x1xi32> to vector<16x32xi32>
    %27 = arith.cmpi eq, %21, %26 : vector<16x32xi32>
    %28 = vector.broadcast %24 : vector<16x1xi1> to vector<16x32xi1>
    %29 = arith.andi %27, %28 : vector<16x32xi1>
    %30 = arith.extui %29 : vector<16x32xi1> to vector<16x32xi32>
    %31 = arith.sitofp %30 : vector<16x32xi32> to vector<16x32xf32>
    %32 = arith.truncf %31 : vector<16x32xf32> to vector<16x32xbf16>
    %cst_8 = arith.constant dense<0.000000e+00> : vector<16x16xf32>
    %33 = tpu.matmul %20, %32, %cst_8 {dimension_numbers = #tpu.dot_dimension_numbers<[1], [1], [0], [0], [0, 0, 1, 0], [], []>} : vector<16x32xbf16>, vector<16x32xbf16>, vector<16x16xf32> -> vector<16x16xf32>
    %c0_9 = arith.constant 0 : index
    %c0_10 = arith.constant 0 : index
    %34 = vector.load %arg4[%c0_9, %c0_10] : memref<16x16xf32, #tpu.memory_space<vmem>>, vector<16x16xf32>
    tpu.vector_store %arg4[%c0_9, %c0_10], %33 {strides = array<i32>} : memref<16x16xf32, #tpu.memory_space<vmem>>, vector<16x16xf32>,
    %cst_11 = arith.constant dense<0.000000e+00> : vector<16xf32>
    %35 = vector.multi_reduction <add>, %33, %cst_11 [1] : vector<16x16xf32> to vector<16xf32>
    %36 = vector.shape_cast %35 : vector<16xf32> to vector<16x1xf32>
    %c0_12 = arith.constant 0 : index
    %c0_13 = arith.constant 0 : index
    %37 = vector.load %arg5[%c0_12, %c0_13] : memref<16x1xf32, #tpu.memory_space<vmem>>, vector<16x1xf32>
    tpu.vector_store %arg5[%c0_12, %c0_13], %36 {strides = array<i32>} : memref<16x1xf32, #tpu.memory_space<vmem>>, vector<16x1xf32>,
    return
  }
  func.func @transform_0(%arg0: i32) -> (i32, i32) {
    %c0_i32 = arith.constant 0 : i32
    %c0_i32_0 = arith.constant 0 : i32
    %c0_i32_1 = arith.constant 0 : i32
    return %c0_i32, %c0_i32_0 : i32, i32
  }
  func.func @transform_1(%arg0: i32) -> (i32, i32) {
    %c0_i32 = arith.constant 0 : i32
    %c0_i32_0 = arith.constant 0 : i32
    return %arg0, %c0_i32 : i32, i32
  }
  func.func @transform_2(%arg0: i32) -> (i32, i32) {
    %c0_i32 = arith.constant 0 : i32
    %c0_i32_0 = arith.constant 0 : i32
    %c0_i32_1 = arith.constant 0 : i32
    return %c0_i32, %c0_i32_0 : i32, i32
  }
  func.func @transform_3(%arg0: i32) -> (i32, i32) {
    %c0_i32 = arith.constant 0 : i32
    %c0_i32_0 = arith.constant 0 : i32
    return %arg0, %c0_i32 : i32, i32
  }
  func.func @transform_4(%arg0: i32) -> (i32, i32) {
    %c0_i32 = arith.constant 0 : i32
    %c0_i32_0 = arith.constant 0 : i32
    return %arg0, %c0_i32 : i32, i32
  }
}

module attributes {stable_mosaic.version = 11 : i64} {
  func.func @_scores_kernel(%arg0: i32, %arg1: memref<32x128xf32, #tpu.memory_space<vmem>>, %arg2: memref<1x128xf32, #tpu.memory_space<vmem>>, %arg3: memref<1x1xf32, #tpu.memory_space<vmem>>, %arg4: memref<32x1xf32, #tpu.memory_space<vmem>>) attributes {dimension_semantics = [#tpu.dimension_semantics<parallel>], iteration_bounds = array<i64: 1>, scalar_prefetch = 0 : i64, scratch_operands = 0 : i64, tpu.core_type = #tpu.core_type<tc>, window_params = [{transform_indices = @transform_0, window_bounds = array<i64: 32, 128>}, {pipeline_mode = #tpu.pipeline_mode<synchronous>, transform_indices = @transform_1, window_bounds = array<i64: 1, 128>}, {pipeline_mode = #tpu.pipeline_mode<synchronous>, transform_indices = @transform_2, window_bounds = array<i64: 1, 1>}, {transform_indices = @transform_3, window_bounds = array<i64: 32, 1>}]} {
    %c0 = arith.constant 0 : index
    %c0_0 = arith.constant 0 : index
    %0 = vector.load %arg1[%c0, %c0_0] : memref<32x128xf32, #tpu.memory_space<vmem>>, vector<32x128xf32>
    %c0_1 = arith.constant 0 : index
    %c0_2 = arith.constant 0 : index
    %1 = vector.load %arg2[%c0_1, %c0_2] : memref<1x128xf32, #tpu.memory_space<vmem>>, vector<1x128xf32>
    %2 = vector.broadcast %1 : vector<1x128xf32> to vector<32x128xf32>
    %3 = arith.mulf %0, %2 : vector<32x128xf32>
    %cst = arith.constant dense<0.000000e+00> : vector<32xf32>
    %4 = vector.multi_reduction <add>, %3, %cst [1] : vector<32x128xf32> to vector<32xf32>
    %5 = vector.shape_cast %4 : vector<32xf32> to vector<32x1xf32>
    %c0_3 = arith.constant 0 : index
    %c0_4 = arith.constant 0 : index
    %6 = vector.load %arg3[%c0_3, %c0_4] : memref<1x1xf32, #tpu.memory_space<vmem>>, vector<1x1xf32>
    %7 = vector.broadcast %6 : vector<1x1xf32> to vector<32x1xf32>
    %8 = arith.addf %5, %7 : vector<32x1xf32>
    %cst_5 = arith.constant 0.000000e+00 : f32
    %9 = vector.broadcast %cst_5 : f32 to vector<32x1xf32>
    %10 = arith.subf %9, %8 : vector<32x1xf32>
    %11 = math.exp %10 : vector<32x1xf32>
    %cst_6 = arith.constant 1.000000e+00 : f32
    %12 = vector.broadcast %cst_6 : f32 to vector<32x1xf32>
    %13 = arith.addf %12, %11 : vector<32x1xf32>
    %14 = tpu.reciprocal %13 : vector<32x1xf32> -> vector<32x1xf32>
    %c0_7 = arith.constant 0 : index
    %c0_8 = arith.constant 0 : index
    %15 = vector.load %arg4[%c0_7, %c0_8] : memref<32x1xf32, #tpu.memory_space<vmem>>, vector<32x1xf32>
    tpu.vector_store %arg4[%c0_7, %c0_8], %14 {strides = array<i32>} : memref<32x1xf32, #tpu.memory_space<vmem>>, vector<32x1xf32>,
    return
  }
  func.func @transform_0(%arg0: i32) -> (i32, i32) {
    %c0_i32 = arith.constant 0 : i32
    %c0_i32_0 = arith.constant 0 : i32
    return %arg0, %c0_i32 : i32, i32
  }
  func.func @transform_1(%arg0: i32) -> (i32, i32) {
    %c0_i32 = arith.constant 0 : i32
    %c0_i32_0 = arith.constant 0 : i32
    %c0_i32_1 = arith.constant 0 : i32
    return %c0_i32, %c0_i32_0 : i32, i32
  }
  func.func @transform_2(%arg0: i32) -> (i32, i32) {
    %c0_i32 = arith.constant 0 : i32
    %c0_i32_0 = arith.constant 0 : i32
    %c0_i32_1 = arith.constant 0 : i32
    return %c0_i32, %c0_i32_0 : i32, i32
  }
  func.func @transform_3(%arg0: i32) -> (i32, i32) {
    %c0_i32 = arith.constant 0 : i32
    %c0_i32_0 = arith.constant 0 : i32
    return %arg0, %c0_i32 : i32, i32
  }
}

module attributes {stable_mosaic.version = 11 : i64} {
  func.func @_norm_kernel(%arg0: i32, %arg1: memref<16x16xf32, #tpu.memory_space<vmem>>, %arg2: memref<1x16xf32, #tpu.memory_space<vmem>>, %arg3: memref<16x16xf32, #tpu.memory_space<vmem>>) attributes {dimension_semantics = [#tpu.dimension_semantics<parallel>], iteration_bounds = array<i64: 1>, scalar_prefetch = 0 : i64, scratch_operands = 0 : i64, tpu.core_type = #tpu.core_type<tc>, window_params = [{transform_indices = @transform_0, window_bounds = array<i64: 16, 16>}, {pipeline_mode = #tpu.pipeline_mode<synchronous>, transform_indices = @transform_1, window_bounds = array<i64: 1, 16>}, {transform_indices = @transform_2, window_bounds = array<i64: 16, 16>}]} {
    %c0 = arith.constant 0 : index
    %c0_0 = arith.constant 0 : index
    %0 = vector.load %arg1[%c0, %c0_0] : memref<16x16xf32, #tpu.memory_space<vmem>>, vector<16x16xf32>
    %c0_1 = arith.constant 0 : index
    %c0_2 = arith.constant 0 : index
    %1 = vector.load %arg2[%c0_1, %c0_2] : memref<1x16xf32, #tpu.memory_space<vmem>>, vector<1x16xf32>
    %2 = tpu.reciprocal %1 : vector<1x16xf32> -> vector<1x16xf32>
    %3 = vector.broadcast %2 : vector<1x16xf32> to vector<16x16xf32>
    %4 = arith.mulf %0, %3 : vector<16x16xf32>
    %c0_3 = arith.constant 0 : index
    %c0_4 = arith.constant 0 : index
    %5 = vector.load %arg3[%c0_3, %c0_4] : memref<16x16xf32, #tpu.memory_space<vmem>>, vector<16x16xf32>
    tpu.vector_store %arg3[%c0_3, %c0_4], %4 {strides = array<i32>} : memref<16x16xf32, #tpu.memory_space<vmem>>, vector<16x16xf32>,
    return
  }
  func.func @transform_0(%arg0: i32) -> (i32, i32) {
    %c0_i32 = arith.constant 0 : i32
    %c0_i32_0 = arith.constant 0 : i32
    return %arg0, %c0_i32 : i32, i32
  }
  func.func @transform_1(%arg0: i32) -> (i32, i32) {
    %c0_i32 = arith.constant 0 : i32
    %c0_i32_0 = arith.constant 0 : i32
    %c0_i32_1 = arith.constant 0 : i32
    return %c0_i32, %c0_i32_0 : i32, i32
  }
  func.func @transform_2(%arg0: i32) -> (i32, i32) {
    %c0_i32 = arith.constant 0 : i32
    %c0_i32_0 = arith.constant 0 : i32
    return %arg0, %c0_i32 : i32, i32
  }
}

module attributes {stable_mosaic.version = 11 : i64} {
  func.func @_gather_scale_kernel(%arg0: i32, %arg1: memref<16x1xi32, #tpu.memory_space<vmem>>, %arg2: memref<16x1xf32, #tpu.memory_space<vmem>>, %arg3: memref<32x128xf32, #tpu.memory_space<vmem>>, %arg4: memref<16x128xf32, #tpu.memory_space<vmem>>) attributes {dimension_semantics = [#tpu.dimension_semantics<parallel>], iteration_bounds = array<i64: 1>, scalar_prefetch = 0 : i64, scratch_operands = 0 : i64, tpu.core_type = #tpu.core_type<tc>, window_params = [{transform_indices = @transform_0, window_bounds = array<i64: 16, 1>}, {transform_indices = @transform_1, window_bounds = array<i64: 16, 1>}, {pipeline_mode = #tpu.pipeline_mode<synchronous>, transform_indices = @transform_2, window_bounds = array<i64: 32, 128>}, {transform_indices = @transform_3, window_bounds = array<i64: 16, 128>}]} {
    %0 = tpu.iota {dimensions = array<i32: 1>} : vector<16x32xi32>
    %c0 = arith.constant 0 : index
    %c0_0 = arith.constant 0 : index
    %1 = vector.load %arg1[%c0, %c0_0] : memref<16x1xi32, #tpu.memory_space<vmem>>, vector<16x1xi32>
    %2 = vector.broadcast %1 : vector<16x1xi32> to vector<16x32xi32>
    %3 = arith.cmpi eq, %0, %2 : vector<16x32xi32>
    %4 = arith.extui %3 : vector<16x32xi1> to vector<16x32xi32>
    %5 = arith.sitofp %4 : vector<16x32xi32> to vector<16x32xf32>
    %c0_1 = arith.constant 0 : index
    %c0_2 = arith.constant 0 : index
    %6 = vector.load %arg3[%c0_1, %c0_2] : memref<32x128xf32, #tpu.memory_space<vmem>>, vector<32x128xf32>
    %cst = arith.constant dense<0.000000e+00> : vector<16x128xf32>
    %7 = tpu.matmul %5, %6, %cst {dimension_numbers = #tpu.dot_dimension_numbers<[1], [0], [0], [1], [0, 0, 1, 1], [], []>} : vector<16x32xf32>, vector<32x128xf32>, vector<16x128xf32> -> vector<16x128xf32>
    %c0_3 = arith.constant 0 : index
    %c0_4 = arith.constant 0 : index
    %8 = vector.load %arg2[%c0_3, %c0_4] : memref<16x1xf32, #tpu.memory_space<vmem>>, vector<16x1xf32>
    %9 = vector.broadcast %8 : vector<16x1xf32> to vector<16x128xf32>
    %10 = arith.mulf %7, %9 : vector<16x128xf32>
    %c0_5 = arith.constant 0 : index
    %c0_6 = arith.constant 0 : index
    %11 = vector.load %arg4[%c0_5, %c0_6] : memref<16x128xf32, #tpu.memory_space<vmem>>, vector<16x128xf32>
    tpu.vector_store %arg4[%c0_5, %c0_6], %10 {strides = array<i32>} : memref<16x128xf32, #tpu.memory_space<vmem>>, vector<16x128xf32>,
    return
  }
  func.func @transform_0(%arg0: i32) -> (i32, i32) {
    %c0_i32 = arith.constant 0 : i32
    %c0_i32_0 = arith.constant 0 : i32
    return %arg0, %c0_i32 : i32, i32
  }
  func.func @transform_1(%arg0: i32) -> (i32, i32) {
    %c0_i32 = arith.constant 0 : i32
    %c0_i32_0 = arith.constant 0 : i32
    return %arg0, %c0_i32 : i32, i32
  }
  func.func @transform_2(%arg0: i32) -> (i32, i32) {
    %c0_i32 = arith.constant 0 : i32
    %c0_i32_0 = arith.constant 0 : i32
    %c0_i32_1 = arith.constant 0 : i32
    return %c0_i32, %c0_i32_0 : i32, i32
  }
  func.func @transform_3(%arg0: i32) -> (i32, i32) {
    %c0_i32 = arith.constant 0 : i32
    %c0_i32_0 = arith.constant 0 : i32
    return %arg0, %c0_i32 : i32, i32
  }
}

</mosaic_0001>

<bundles_post_ra>
// kernel: pool_forward.4
= control target key start
LH: loop header
LB: loop body
LE: loop exit
PB: predicated region body
PF: predicated region fallthrough
CT: control target
= control target key end

     0   :  { %s192_s0 = inlined_call_operand.hbm [shape: f32[32,128], index: 0, kind: input, shape index: {}]   ;;  %s193_s1 = inlined_call_operand.vmem [shape: f32[1,128], index: 1, kind: input, shape index: {}]   ;;  %s194_s2 = inlined_call_operand.<no memory space> [shape: f32[1,1], index: 2, kind: input, shape index: {}]   ;;  %s195_s3 = inlined_call_operand.vmem [shape: f32[32,1], index: 3, kind: output, shape index: {}]  }
   0x1   :  { %v8_v0 = vstv %s194_s2 }
   0x2   :  { %9 = vst [vmem:[#allocation2] sm:$0x1] %v8_v0 }
   0x3   :  { %10 = vsyncpa [#allocation4], 0  ;;  %s139_s14 = smov [#allocation3]   ;;  %s115_s18 = scalar_lea.hbm %s192_s0, 512 }
   0x4   :  { %s16_s15 = sshll.u32 %s139_s14, 4  ;;  %p116_p0 = scmp.ne.s32.totalorder %s192_s0, %s115_s18  ;;  %s17_s15 = int_to_ptr.vmem [resolvable:$true] %s16_s15 }
   0x5   :  { %p119_p1 = scmp.lt.u32.totalorder %s115_s18, %s192_s0 }
   0x7   :  { %p121_p2 = pnand %p119_p1, %p116_p0 }
   0x9   :  { %124 = shalt.err (!%p121_p2)
}
   0xa   :  { %s125_s2 = scalar_lea.vmem %s17_s15, 512  ;;  %p130_p4 = scmp.lt.s32.totalorder %s17_s15, %s17_s15 }
   0xb   :  { %p126_p3 = scmp.ne.s32.totalorder %s17_s15, %s125_s2  ;;  %p131_p5 = scmp.lt.s32.totalorder %s125_s2, %s125_s2 }
   0xd   :  { %p132_p6 = por %p131_p5, %p130_p4 }
   0xf   :  { %p133_p7 = pnand %p132_p6, %p126_p3 }
  0x11   :  { %136 = shalt.err (!%p133_p7)
}
  0x12   :  { %s140_s23 = smov 128   ;;  %s141_s24 = smov 8  }
  0x13   :  { %22 = dma.hbm_to_vmem [thread:$0]  %s192_s0, 512, %s17_s15, [#allocation4], %s140_s23, %s140_s23, %s141_s24  }
  0x14   :  { %137 = dma.done.wait [#allocation4], 512  }
  0x15   :  { %138 = vsyncadd [#allocation4], 4294966784  ;;  %v32_v1 = vld [vmem:[#allocation3 + $0x10] sm:$0xff]  ;;  %v94_v2 = vld [vmem:[%s193_s1] ss:$0 sm:$0xff]  ;;  %vm84_vm0 = vcmask 7168  }
  0x16   :  { %v30_v3 = vld [vmem:[#allocation3] sm:$0xff]  ;;  %v43_v4 = vmul.f32 %v94_v2, %v32_v1  ;;  %v33_v6 = vld [vmem:[#allocation3 + $0x18] sm:$0xff]  ;;  %v31_v7 = vld [vmem:[#allocation3 + $0x8] sm:$0xff] }
  0x17   :  { %v41_v5 = vmul.f32 %v94_v2, %v30_v3  ;;  %v44_v8 = vmul.f32 %v94_v2, %v33_v6  ;;  %v42_v9 = vmul.f32 %v94_v2, %v31_v7  ;;  %v95_v10 = vld [vmem:[#allocation2] ss:$0 sm:$0xff] }
  0x18   :  { %49 = vadd.xlane.f32.xlu1 %v43_v4 }
  0x19   :  { %45 = vadd.xlane.f32.xlu0 %v41_v5 }
  0x1c   :  { %51 = vadd.xlane.f32.xlu1 %v44_v8 }
  0x1d   :  { %47 = vadd.xlane.f32.xlu0 %v42_v9 }
  0xa5   :  { %v50_v11 = vpop.xlane.xlu1 %49 }
  0xa6   :  { %v46_v12 = vpop.xlane.xlu0 %45  ;;  %v62_v13 = vadd.f32 %v95_v10, %v50_v11 }
  0xa7   :  { %v60_v14 = vadd.f32 %v95_v10, %v46_v12 }
  0xa8   :  { %v66_v15 = vsub.f32 0.0, %v62_v13 }
  0xa9   :  { %v64_v16 = vsub.f32 0.0, %v60_v14  ;;  %v52_v17 = vpop.xlane.xlu1 %51 }
  0xaa   :  { %v48_v18 = vpop.xlane.xlu0 %47  ;;  %v72_v19 = vmul.f32 1.442695, %v66_v15  ;;  %v63_v21 = vadd.f32 %v95_v10, %v52_v17 }
  0xab   :  { %v68_v20 = vmul.f32 1.442695, %v64_v16  ;;  %v61_v22 = vadd.f32 %v95_v10, %v48_v18 }
  0xac   :  { %99 = vpow2.f32 %v72_v19  ;;  %v67_v23 = vsub.f32 0.0, %v63_v21 }
  0xad   :  { %v65_v24 = vsub.f32 0.0, %v61_v22  ;;  %101 = vpow2.f32 %v68_v20 }
  0xae   :  { %v74_v25 = vmul.f32 1.442695, %v67_v23 }
  0xaf   :  { %v70_v26 = vmul.f32 1.442695, %v65_v24 }
  0xb0   :  { %103 = vpow2.f32 %v74_v25 }
  0xb1   :  { %105 = vpow2.f32 %v70_v26 }
  0xb6   :  { %v100_v27 = vpop.eup %99 }
  0xb7   :  { %v102_v28 = vpop.eup %101  ;;  %v78_v29 = vadd.f32 1.0, %v100_v27 }
  0xb8   :  { %v76_v30 = vadd.f32 1.0, %v102_v28 }
  0xb9   :  { %107 = vrcp.f32 %v78_v29 }
  0xba   :  { %v104_v31 = vpop.eup %103  ;;  %109 = vrcp.f32 %v76_v30 }
  0xbb   :  { %v106_v32 = vpop.eup %105  ;;  %v79_v33 = vadd.f32 1.0, %v104_v31 }
  0xbc   :  { %v77_v34 = vadd.f32 1.0, %v106_v32 }
  0xbd   :  { %111 = vrcp.f32 %v79_v33 }
  0xbe   :  { %113 = vrcp.f32 %v77_v34 }
  0xc3   :  { %v108_v35 = vpop.eup %107 }
  0xc4   :  { %v110_v36 = vpop.eup %109  ;;  %87 = vst.msk [vmem:[%s195_s3 + $0x10] sm:$0xff] %vm84_vm0, %v108_v35 }
  0xc5   :  { %85 = vst.msk [vmem:[%s195_s3] sm:$0xff] %vm84_vm0, %v110_v36 }
  0xc7   :  { %v112_v37 = vpop.eup %111 }
  0xc8   :  { %v114_v38 = vpop.eup %113  ;;  %88 = vst.msk [vmem:[%s195_s3 + $0x18] sm:$0xff] %vm84_vm0, %v112_v37 }
  0xc9   :  { %86 = vst.msk [vmem:[%s195_s3 + $0x8] sm:$0xff] %vm84_vm0, %v114_v38 }
  0xca   :  { %93 = vsyncpa [#allocation4], 1 }

// kernel: pool_forward.7
= control target key start
LH: loop header
LB: loop body
LE: loop exit
PB: predicated region body
PF: predicated region fallthrough
CT: control target
= control target key end

     0   :  { %v17_v1 = vlaneseq  ;;  %s111_s0 = inlined_call_operand.vmem [shape: f32[16,16], index: 0, kind: input, shape index: {}]   ;;  %s112_s1 = inlined_call_operand.vmem [shape: f32[1,16], index: 1, kind: input, shape index: {}]   ;;  %s113_s2 = inlined_call_operand.hbm [shape: f32[16,16], index: 2, kind: output, shape index: {}]  }
   0x1   :  { %v14_v0 = vld [vmem:[%s112_s1] sm:$0x1] }
   0x2   :  { %46 = vrcp.f32 %v14_v0 }
   0x3   :  { %7 = vsyncpa [#allocation3], 0  ;;  %v18_v2 = vshrl.u32 %v17_v1, 7  ;;  %v12_v5 = vld [vmem:[%s111_s0] sm:$0xff]  ;;  %v13_v6 = vld [vmem:[%s111_s0 + $0x8] sm:$0xff]  ;;  %s72_s15 = smov [#allocation2]  }
   0x4   :  { %s32_s16 = sshll.u32 %s72_s15, 4  ;;  %vm24_vm0 = vcmask 130048   ;;  %s33_s16 = int_to_ptr.vmem [resolvable:$true] %s32_s16 }
   0x5   :  { %v19_v3 = vsub.s32 0, %v18_v2  ;;  %s48_s1 = scalar_lea.vmem %s33_s16, 256  ;;  %p53_p1 = scmp.lt.s32.totalorder %s33_s16, %s33_s16 }
   0x6   :  { %p49_p0 = scmp.ne.s32.totalorder %s33_s16, %s48_s1  ;;  %p54_p2 = scmp.lt.s32.totalorder %s48_s1, %s48_s1 }
   0x8   :  { %p55_p3 = por %p54_p2, %p53_p1 }
   0xa   :  { %p56_p4 = pnand %p55_p3, %p49_p0 }
   0xc   :  { %v47_v4 = vpop.eup %46 }
   0xd   :  { %v20_v7 = vrot.slane %v47_v4, %v19_v3 }
   0xf   :  { %v22_v8 = vmul.f32 %v20_v7, %v12_v5  ;;  %v23_v9 = vmul.f32 %v20_v7, %v13_v6 }
  0x11   :  { %25 = vst.msk [vmem:[#allocation2] sm:$0xff] %vm24_vm0, %v22_v8  ;;  %26 = vst.msk [vmem:[#allocation2 + $0x8] sm:$0xff] %vm24_vm0, %v23_v9 }
  0x12   :  { %59 = shalt.err (!%p56_p4)
}
  0x13   :  { %s60_s0 = scalar_lea.hbm %s113_s2, 256 }
  0x14   :  { %p61_p5 = scmp.ne.s32.totalorder %s113_s2, %s60_s0  ;;  %p64_p6 = scmp.lt.u32.totalorder %s60_s0, %s113_s2 }
  0x16   :  { %p66_p7 = pnand %p64_p6, %p61_p5 }
  0x18   :  { %69 = shalt.err (!%p66_p7)
}
  0x19   :  { %s73_s23 = smov 128   ;;  %s74_s24 = smov 8  }
  0x1a   :  { %38 = dma.vmem_to_hbm [thread:$0]  %s33_s16, 256, %s113_s2, [#allocation3], %s73_s23, %s73_s23, %s74_s24  }
  0x1b   :  { %70 = dma.done.wait [#allocation3], 256  }
  0x1c   :  { %71 = vsyncadd [#allocation3], 4294967040 }
  0x1d   :  { %42 = vsyncpa [#allocation3], 1 }

// kernel: pool_forward.5
= control target key start
LH: loop header
LB: loop body
LE: loop exit
PB: predicated region body
PF: predicated region fallthrough
CT: control target
= control target key end

     0   :  { %v209_v2 = vmov 0   ;;  %s270_s0 = inlined_call_operand.vmem [shape: s32[16,1], index: 0, kind: input, shape index: {}]   ;;  %s271_s1 = inlined_call_operand.vmem [shape: f32[16,1], index: 1, kind: input, shape index: {}]   ;;  %s272_s2 = inlined_call_operand.vmem [shape: f32[32,128], index: 2, kind: input, shape index: {}]   ;;  %s273_s3 = inlined_call_operand.hbm [shape: f32[16,128], index: 3, kind: output, shape index: {}]  }
   0x1   :  { %v17_v0 = vld [vmem:[%s270_s0] sm:$0xff]  ;;  %183 = vset.pattern.permute.xlu0 %v209_v2  ;;  %v32_v3 = vld [vmem:[%s272_s2 + $0x8] sm:$0xff]  ;;  %v33_v4 = vld [vmem:[%s272_s2 + $0x10] sm:$0xff]  ;;  %184 = vset.pattern.permute.xlu1 %v209_v2 }
   0x2   :  { %v31_v1 = vld [vmem:[%s272_s2] sm:$0xff]  ;;  %v34_v5 = vld [vmem:[%s272_s2 + $0x18] sm:$0xff]  ;;  %20 = vperm.xlu0 %183, %v17_v0  }
   0x3   :  { %v170_v6 = vpack.c.bf16 %v32_v3, %v31_v1  ;;  %v174_v7 = vpack.c.bf16 %v34_v5, %v33_v4 }
   0x4   :  { %8 = vsyncpa [#allocation3], 0  ;;  %v18_v8 = vld [vmem:[%s270_s0 + $0x8] sm:$0xff]  ;;  %v117_v9 = vld [vmem:[%s271_s1] sm:$0xff]  ;;  %v15_v11 = vlaneseq  ;;  %vm35_vm0 = vcmask 261120   ;;  %v210_v14 = vmov 0.0  }
   0x5   :  { %171 = vmatprep.subr.bf16.mxu0 %v170_v6  ;;  %121 = vperm.xlu1 %184, %v117_v9   ;;  %v118_v10 = vld [vmem:[%s271_s1 + $0x8] sm:$0xff]  ;;  %s211_s0 = smov [#allocation2]  }
   0x6   :  { %173 = vmatpush3.bf16.msra.mxu0 %v170_v6  ;;  %23 = vperm.xlu0 %183, %v18_v8   ;;  %v16_v12 = vand.u32 127, %v15_v11  ;;  %s138_s27 = sshll.u32 %s211_s0, 4  ;;  %s139_s27 = int_to_ptr.vmem [resolvable:$true] %s138_s27 }
   0x7   :  { %175 = vmatprep.subr.bf16.mxu0 %v174_v7  ;;  %s185_s1 = scalar_lea.vmem %s139_s27, 256  ;;  %p190_p1 = scmp.lt.s32.totalorder %s139_s27, %s139_s27 }
   0x8   :  { %p186_p0 = scmp.ne.s32.totalorder %s139_s27, %s185_s1  ;;  %p191_p2 = scmp.lt.s32.totalorder %s185_s1, %s185_s1 }
   0x9   :  { %126 = vperm.xlu1 %184, %v118_v10  }
   0xa   :  { %177 = vmatpush3.bf16.msra.mxu0 %v174_v7  ;;  %p192_p3 = por %p191_p2, %p190_p1 }
   0xc   :  { %p193_p4 = pnand %p192_p3, %p186_p0 }
  0x81   :  { %v21_v13 = vpop.permute.xlu0 %20 }
  0x82   :  { %vm25_vm1 = vcmp.eq.s32.totalorder %v16_v12, %v21_v13 }
  0x83   :  { %v149_v15 = vsel %vm25_vm1, 1.0, %v210_v14 }
  0x84   :  { %167 = vmatprep.mubr.msk.f32.mxu0 %vm35_vm0, %v149_v15  ;;  %v122_v18 = vpop.permute.xlu1 %121 }
  0x85   :  { %v24_v16 = vpop.permute.xlu0 %23 }
  0x86   :  { %vm26_vm2 = vcmp.eq.s32.totalorder %v16_v12, %v24_v16 }
  0x87   :  { %v150_v17 = vsel %vm26_vm2, 1.0, %v210_v14 }
  0x88   :  { %168 = vmatmul.mubr.msk.f32.vlgmr.msra.gmra.mrb[0].mxu0 %vm35_vm0, %v150_v17  ;;  %v127_v19 = vpop.permute.xlu1 %126 }
 0x15b   :  { %v169_v20 = vpop.f32.mrb[0].mxu0 }
 0x15c   :  { %v130_v21 = vmul.f32 %v169_v20, %v127_v19  ;;  %v108_v22 = vpop.f32.mrb[1].mxu0 }
 0x15d   :  { %v129_v23 = vmul.f32 %v122_v18, %v108_v22 }
 0x15e   :  { %132 = vst [vmem:[#allocation2 + $0x8] sm:$0xff] %v130_v21 }
 0x15f   :  { %131 = vst [vmem:[#allocation2] sm:$0xff] %v129_v23 }
 0x160   :  { %196 = shalt.err (!%p193_p4)
}
 0x161   :  { %s197_s30 = scalar_lea.hbm %s273_s3, 256 }
 0x162   :  { %p198_p5 = scmp.ne.s32.totalorder %s273_s3, %s197_s30  ;;  %p201_p6 = scmp.lt.u32.totalorder %s197_s30, %s273_s3 }
 0x164   :  { %p203_p7 = pnand %p201_p6, %p198_p5 }
 0x166   :  { %206 = shalt.err (!%p203_p7)
}
 0x167   :  { %s212_s8 = smov 128   ;;  %s213_s9 = smov 8  }
 0x168   :  { %144 = dma.vmem_to_hbm [thread:$0]  %s139_s27, 256, %s273_s3, [#allocation3], %s212_s8, %s212_s8, %s213_s9  }
 0x169   :  { %207 = dma.done.wait [#allocation3], 256  }
 0x16a   :  { %208 = vsyncadd [#allocation3], 4294967040 }
 0x16b   :  { %148 = vsyncpa [#allocation3], 1 }

// kernel: pool_forward.6
= control target key start
LH: loop header
LB: loop body
LE: loop exit
PB: predicated region body
PF: predicated region fallthrough
CT: control target
= control target key end

     0   :  { %v299_v0 = vmov 0   ;;  %v300_v2 = vmov 0.0   ;;  %v301_v8 = vmov 1.0|1.0   ;;  %vm302_vm6 = vmmov 0   ;;  %s385_s1 = inlined_call_operand.vmem [shape: s32[16,1], index: 1, kind: input, shape index: {}, may-alias: {1,2}]   ;;  %s386_s0 = inlined_call_operand.vmem [shape: f32[32,32], index: 0, kind: input, shape index: {}]   ;;  %s387_s2 = inlined_call_operand.vmem [shape: s32[16,1], index: 2, kind: input, shape index: {}, may-alias: {1,2}]   ;;  %s388_s3 = inlined_call_operand.vmem [shape: f32[16,16], index: 3, kind: output, shape index: {0}]   ;;  %s389_s4 = inlined_call_operand.vmem [shape: f32[16,1], index: 4, kind: output, shape index: {1}]  }
   0x1   :  { %297 = vset.pattern.permute.xlu0 %v299_v0  ;;  %v37_v1 = vld [vmem:[%s385_s1] sm:$0xff]  ;;  %271 = vmatprep.subr.bf16.mxu0 %v300_v2  ;;  %v18_v4 = vld [vmem:[%s386_s0 + $0x8] sm:$0xff]  ;;  %v19_v6 = vld [vmem:[%s386_s0 + $0x10] sm:$0xff]  ;;  %v35_v9 = vlaneseq  ;;  %vm52_vm9 = vcmask 261120   ;;  %vm222_vm14 = vcmask 130048   ;;  %vm231_vm15 = vcmask 7168  }
   0x2   :  { %v17_v3 = vld [vmem:[%s386_s0] sm:$0xff]  ;;  %40 = vperm.xlu0 %297, %v37_v1   ;;  %279 = vmatprep.subr.bf16.mxu1 %v300_v2  ;;  %v38_v5 = vld [vmem:[%s385_s1 + $0x8] sm:$0xff]  ;;  %vm22_vm1 = vcmp.ne.f32.partialorder %v18_v4, 0.0  ;;  %v20_v7 = vld [vmem:[%s386_s0 + $0x18] sm:$0xff]  ;;  %vm23_vm3 = vcmp.ne.f32.partialorder %v19_v6, 0.0 }
   0x3   :  { %vm21_vm0 = vcmp.ne.f32.partialorder %v17_v3, 0.0  ;;  %298 = vset.pattern.permute.xlu1 %v299_v0  ;;  %vm24_vm4 = vcmp.ne.f32.partialorder %v20_v7, 0.0  ;;  %275 = vmatprep.mubr.msk.bf16.mxu0 %vm302_vm6, %v300_v2  ;;  %v36_v10 = vand.u32 127, %v35_v9  ;;  %v154_v16 = vld [vmem:[%s387_s2] sm:$0xff]  ;;  %v155_v17 = vld [vmem:[%s387_s2 + $0x8] sm:$0xff] }
   0x4   :  { %vm248_vm2 = vmpackc.low %vm22_vm1, %vm21_vm0  ;;  %283 = vmatprep.mubr.msk.bf16.mxu1 %vm302_vm6, %v300_v2  ;;  %157 = vperm.xlu1 %298, %v154_v16  }
   0x5   :  { %272 = vmatpush3.bf16.msk.msra.mxu0 %vm248_vm2, %v301_v8  ;;  %280 = vmatpush3.bf16.msk.msra.mxu1 %vm248_vm2, %v301_v8  ;;  %vm250_vm5 = vmpackc.low %vm24_vm4, %vm23_vm3 }
   0x6   :  { %43 = vperm.xlu0 %297, %v38_v5   ;;  %273 = vmatprep.subr.bf16.mxu0 %v300_v2 }
   0x7   :  { %281 = vmatprep.subr.bf16.mxu1 %v300_v2 }
   0x8   :  { %160 = vperm.xlu1 %298, %v155_v17  }
   0x9   :  { %274 = vmatpush3.bf16.msk.msra.mxu0 %vm250_vm5, %v301_v8  ;;  %282 = vmatpush3.bf16.msk.msra.mxu1 %vm250_vm5, %v301_v8 }
   0xa   :  { %287 = vmatprep.subr.bf16.mxu0 %v300_v2 }
  0x81   :  { %v41_v11 = vpop.permute.xlu0 %40 }
  0x82   :  { %vm45_vm7 = vcmp.eq.s32.totalorder %v36_v10, %v41_v11 }
  0x83   :  { %v246_v13 = vsel %vm45_vm7, 1.0, %v300_v2  ;;  %v158_v23 = vpop.permute.xlu1 %157 }
  0x84   :  { %vm162_vm10 = vcmp.eq.s32.totalorder %v36_v10, %v158_v23 }
  0x85   :  { %v44_v12 = vpop.permute.xlu0 %43  ;;  %v260_v24 = vsel %vm162_vm10, 1.0, %v300_v2 }
  0x86   :  { %vm46_vm8 = vcmp.eq.s32.totalorder %v36_v10, %v44_v12 }
  0x87   :  { %v247_v14 = vsel %vm46_vm8, 1.0, %v300_v2  ;;  %v161_v25 = vpop.permute.xlu1 %160 }
  0x88   :  { %v51_v15 = vpack.c.bf16 %v247_v14, %v246_v13  ;;  %vm163_vm11 = vcmp.eq.s32.totalorder %v36_v10, %v161_v25 }
  0x89   :  { %v261_v26 = vsel %vm163_vm11, 1.0, %v300_v2 }
  0x8a   :  { %276 = vmatmul.mubr.msk.bf16.vlgmr.msra.gmra.mrb[0].mxu0 %vm52_vm9, %v51_v15  ;;  %v174_v27 = vpack.c.bf16 %v261_v26, %v260_v24 }
  0x8b   :  { %289 = vmatprep.mubr.msk.bf16.mxu0 %vm302_vm6, %v300_v2 }
  0x8c   :  { %v179_v28 = vsel %vm52_vm9, %v174_v27, 0 }
  0x8d   :  { %288 = vmatpush3.bf16.xpose.msra.mxu0 %v179_v28 }
 0x15d   :  { %v90_v18 = vpop.f32.mrb[0].mxu0 }
 0x15e   :  { %v277_v19 = vpop.f32.mrb[1].mxu0 }
 0x15f   :  { %v93_v20 = vpop.f32.mrb[2].mxu0 }
 0x160   :  { %v97_v21 = vpack.c.bf16 %v93_v20, %v90_v18  ;;  %v278_v22 = vpop.f32.mrb[3].mxu0 }
 0x162   :  { %284 = vmatmul.mubr.msk.bf16.vlgmr.msra.gmra.mrb[0].mxu1 %vm52_vm9, %v97_v21 }
 0x235   :  { %v135_v29 = vpop.f32.mrb[0].mxu1 }
 0x236   :  { %vm142_vm12 = vcmp.gt.f32.partialorder %v135_v29, 0.0  ;;  %v285_v30 = vpop.f32.mrb[1].mxu1 }
 0x237   :  { %v138_v31 = vpop.f32.mrb[2].mxu1  ;;  %v258_v33 = vsel %vm142_vm12, 1.0, %v300_v2 }
 0x238   :  { %vm143_vm13 = vcmp.gt.f32.partialorder %v138_v31, 0.0  ;;  %v286_v32 = vpop.f32.mrb[3].mxu1 }
 0x239   :  { %v259_v34 = vsel %vm143_vm13, 1.0, %v300_v2 }
 0x23a   :  { %v148_v35 = vpack.c.bf16 %v259_v34, %v258_v33 }
 0x23c   :  { %290 = vmatmul.mubr.msk.bf16.vlgmr.msra.gmra.mrb[4].mxu0 %vm52_vm9, %v148_v35 }
 0x30f   :  { %v215_v36 = vpop.f32.mrb[4].mxu0 }
 0x310   :  { %223 = vst.msk [vmem:[%s388_s3] sm:$0xff] %vm222_vm14, %v215_v36  ;;  %v291_v37 = vpop.f32.mrb[5].mxu0  ;;  %v225_v38 = vsel %vm222_vm14, %v215_v36, 0.0 }
 0x311   :  { %226 = vadd.xlane.f32.xlu0 %v225_v38  ;;  %v218_v39 = vpop.f32.mrb[6].mxu0 }
 0x312   :  { %224 = vst.msk [vmem:[%s388_s3 + $0x8] sm:$0xff] %vm222_vm14, %v218_v39  ;;  %v292_v40 = vpop.f32.mrb[7].mxu0  ;;  %v228_v41 = vsel %vm222_vm14, %v218_v39, 0.0 }
 0x313   :  { %229 = vadd.xlane.f32.xlu1 %v228_v41 }
 0x39e   :  { %v227_v42 = vpop.xlane.xlu0 %226 }
 0x39f   :  { %232 = vst.msk [vmem:[%s389_s4] sm:$0xff] %vm231_vm15, %v227_v42 }
 0x3a0   :  { %v230_v43 = vpop.xlane.xlu1 %229 }
 0x3a1   :  { %233 = vst.msk [vmem:[%s389_s4 + $0x8] sm:$0xff] %vm231_vm15, %v230_v43 }

</bundles_post_ra>
